<compile_context>
chip_gen: v7x
topology: tpu7x:2x2x1
jax: 0.10.0
libtpu: 0.0.40
codegen_flags: <defaults>
</compile_context>

<pallas_src>
import functools
import math

import jax
import jax.numpy as jnp
from jax import lax
from jax.experimental import pallas as pl
from jax.experimental.pallas import tpu as pltpu


def _scalenorm_kernel(scale_ref, x_ref, o_ref, *, eps):
    # scale_ref: (1,) f32 in SMEM.  x_ref / o_ref: (block_rows, D) in VMEM.
    x = x_ref[...]
    xf = x.astype(jnp.float32)                                   # single cast
    sq_sum = jnp.sum(xf * xf, axis=-1, keepdims=True)            # (tm, 1) f32
    scale = scale_ref[0]
    # scale / max(sqrt(s), eps) == scale * rsqrt(max(s, eps^2))   (eps > 0)
    factor = scale * lax.rsqrt(jnp.maximum(sq_sum, eps * eps))   # (tm, 1) f32
    o_ref[...] = (xf * factor).astype(o_ref.dtype)


def _round_down_32(n):
    return (n // 32) * 32


def _pick_block_rows(n_rows, d, itemsize, vmem_budget_bytes):
    # in + out tiles, each double-buffered => 4 buffers of (tm, D) in x.dtype.
    per_row_bytes = 4 * d * itemsize
    tm = max(1, vmem_budget_bytes // per_row_bytes)
    tm = min(tm, 2048)  # past the measured roofline knee; bigger buys ~nothing
    # v7x megacore: give the ("parallel",) grid at least ~4 steps when the row
    # count allows it, so both TensorCores get work.  Harmless on v5e/v6e.
    if n_rows >= 4 * 32:
        tm = min(tm, max(32, _round_down_32(pl.cdiv(n_rows, 4))))
    tm = min(tm, n_rows)
    # Multiple of 32 rows: keeps native (16,128)/(32,128) packed tiles whole
    # for bf16 / int8 / fp8 inputs.  Min 32 (ragged last block handles excess).
    tm = max(32, _round_down_32(tm))
    return int(tm)


def _scale_norm_xla(x, scale, eps):
    # Fallback for lane-sparse last dims (D % 128 != 0): plain XLA fuses this.
    xf = x.astype(jnp.float32)
    norm = jnp.sqrt(jnp.sum(xf * xf, axis=-1, keepdims=True))
    factor = jnp.asarray(scale, jnp.float32) / jnp.maximum(norm, eps)
    return (xf * factor).astype(x.dtype)


def scale_norm(x, scale, eps=1e-05, *, block_rows=None,
               vmem_budget_bytes=16 << 20):
    """x: (..., D). Returns x * scale / clamp(||x||_2 over last dim, eps).

    `scale` may be a Python float or a (traced) JAX scalar (learnable param).
    `eps` must be a static Python float (constructor constant in ScaleNorm).
    """
    orig_shape = x.shape
    D = orig_shape[-1]

    if D % 128 != 0:
        # Last dim not lane-dense; Pallas path would run masked partial stores
        # at <= D/128 lane occupancy.  Let XLA handle it.
        return _scale_norm_xla(x, scale, eps)

    x2d = x.reshape(-1, D)
    R = x2d.shape[0]
    itemsize = jnp.dtype(x.dtype).itemsize

    if block_rows is None:
        block_rows = _pick_block_rows(R, D, itemsize, vmem_budget_bytes)

    num_tiles = pl.cdiv(R, block_rows)  # ragged last block handled by Pallas

    # VMEM actually needed: in + out tiles, double-buffered, + Mosaic headroom.
    footprint = 4 * block_rows * D * itemsize
    vmem_limit = min(int(footprint) + (8 << 20), 48 << 20)  # safe on v7x 64MiB

    scale_arr = jnp.asarray(scale, dtype=jnp.float32).reshape(1)
    kernel = functools.partial(_scalenorm_kernel, eps=float(eps))

    out = pl.pallas_call(
        kernel,
        out_shape=jax.ShapeDtypeStruct((R, D), x.dtype),
        grid=(num_tiles,),
        in_specs=[
            pl.BlockSpec(memory_space=pltpu.MemorySpace.SMEM),   # scale scalar
            pl.BlockSpec((block_rows, D), lambda i: (i, 0)),     # x tile
        ],
        out_specs=pl.BlockSpec((block_rows, D), lambda i: (i, 0)),
        compiler_params=pltpu.CompilerParams(
            dimension_semantics=("parallel",),
            vmem_limit_bytes=vmem_limit,
        ),
    )(scale_arr, x2d)

    return out.reshape(orig_shape)


def _reference(x, scale, eps=1e-05):
    xf = x.astype(jnp.float32)
    norm = jnp.sqrt(jnp.sum(xf * xf, axis=-1, keepdims=True))
    norm = jnp.maximum(norm, eps)
    return (xf * (jnp.asarray(scale, jnp.float32) / norm)).astype(x.dtype)


if __name__ == "__main__":
    eps = 1e-05

    # Main test: (batch, seq, hidden) with a lane-dense hidden dim.
    B, S, D = 2, 8, 128
    x = jax.random.normal(jax.random.PRNGKey(0), (B, S, D), dtype=jnp.float32)
    scale = jnp.asarray(math.sqrt(D), dtype=jnp.float32)  # learnable in torch

    out = jax.block_until_ready(scale_norm(x, scale, eps))
    ref = _reference(x, scale, eps)
    assert out.shape == x.shape and out.dtype == x.dtype
    assert jnp.allclose(out, ref, atol=1e-5, rtol=1e-5), "mismatch vs reference"

    # Ragged row count (R = 15) — exercises the unpadded partial last block.
    x2 = jax.random.normal(jax.random.PRNGKey(1), (3, 5, D), dtype=jnp.float32)
    out2 = jax.block_until_ready(scale_norm(x2, scale, eps))
    ref2 = _reference(x2, scale, eps)
    assert jnp.allclose(out2, ref2, atol=1e-5, rtol=1e-5), "mismatch (ragged rows)"

    # bf16 input under jit with a traced (learnable) scale — SMEM scalar path.
    x3 = jax.random.normal(jax.random.PRNGKey(2), (B, S, D), dtype=jnp.bfloat16)
    jitted = jax.jit(functools.partial(scale_norm, eps=eps))
    out3 = jax.block_until_ready(jitted(x3, scale))
    ref3 = _reference(x3, scale, eps)
    assert out3.dtype == x3.dtype
    assert jnp.allclose(out3.astype(jnp.float32), ref3.astype(jnp.float32),
                        atol=2e-2, rtol=2e-2), "mismatch (bf16/jit)"

    # Tiny hidden dim (D=32) routes through the XLA fallback.
    x4 = jax.random.normal(jax.random.PRNGKey(3), (2, 8, 32), dtype=jnp.float32)
    s4 = jnp.asarray(math.sqrt(32), dtype=jnp.float32)
    out4 = jax.block_until_ready(scale_norm(x4, s4, eps))
    ref4 = _reference(x4, s4, eps)
    assert jnp.allclose(out4, ref4, atol=1e-5, rtol=1e-5), "mismatch (XLA fallback)"

    print("KERNEL_OK")
</pallas_src>

<mosaic_0001>
module attributes {stable_mosaic.version = 11 : i64} {
  func.func @_scalenorm_kernel(%arg0: i32, %arg1: memref<1xf32, #tpu.memory_space<smem>>, %arg2: memref<32x128xf32, #tpu.memory_space<vmem>>, %arg3: memref<32x128xf32, #tpu.memory_space<vmem>>) attributes {dimension_semantics = [#tpu.dimension_semantics<parallel>], iteration_bounds = array<i64: 1>, scalar_prefetch = 0 : i64, scratch_operands = 0 : i64, tpu.core_type = #tpu.core_type<tc>, window_params = [{transform_indices = @transform_0, window_bounds = array<i64: 1>}, {transform_indices = @transform_1, window_bounds = array<i64: 32, 128>}, {transform_indices = @transform_2, window_bounds = array<i64: 32, 128>}]} {
    %c0 = arith.constant 0 : index
    %c0_0 = arith.constant 0 : index
    %0 = vector.load %arg2[%c0, %c0_0] : memref<32x128xf32, #tpu.memory_space<vmem>>, vector<32x128xf32>
    %1 = arith.mulf %0, %0 : vector<32x128xf32>
    %cst = arith.constant dense<0.000000e+00> : vector<32xf32>
    %2 = vector.multi_reduction <add>, %1, %cst [1] : vector<32x128xf32> to vector<32xf32>
    %3 = vector.shape_cast %2 : vector<32xf32> to vector<32x1xf32>
    %c0_1 = arith.constant 0 : index
    %4 = memref.load %arg1[%c0_1] : memref<1xf32, #tpu.memory_space<smem>>
    %cst_2 = arith.constant 1.000000e-10 : f32
    %5 = vector.broadcast %cst_2 : f32 to vector<32x1xf32>
    %6 = arith.maximumf %3, %5 : vector<32x1xf32>
    %7 = math.rsqrt %6 : vector<32x1xf32>
    %8 = vector.broadcast %4 : f32 to vector<32x1xf32>
    %9 = arith.mulf %8, %7 : vector<32x1xf32>
    %10 = vector.broadcast %9 : vector<32x1xf32> to vector<32x128xf32>
    %11 = arith.mulf %0, %10 : vector<32x128xf32>
    %c0_3 = arith.constant 0 : index
    %c0_4 = arith.constant 0 : index
    %12 = vector.load %arg3[%c0_3, %c0_4] : memref<32x128xf32, #tpu.memory_space<vmem>>, vector<32x128xf32>
    tpu.vector_store %arg3[%c0_3, %c0_4], %11 {strides = array<i32>} : memref<32x128xf32, #tpu.memory_space<vmem>>, vector<32x128xf32>,
    return
  }
  func.func @transform_0(%arg0: i32) -> i32 {
    %c0_i32 = arith.constant 0 : i32
    %c0_i32_0 = arith.constant 0 : i32
    return %c0_i32 : i32
  }
  func.func @transform_1(%arg0: i32) -> (i32, i32) {
    %c0_i32 = arith.constant 0 : i32
    %c0_i32_0 = arith.constant 0 : i32
    return %arg0, %c0_i32 : i32, i32
  }
  func.func @transform_2(%arg0: i32) -> (i32, i32) {
    %c0_i32 = arith.constant 0 : i32
    %c0_i32_0 = arith.constant 0 : i32
    return %arg0, %c0_i32 : i32, i32
  }
}

</mosaic_0001>

<bundles_post_ra>
// kernel: tpu_custom_call.1
= control target key start
LH: loop header
LB: loop body
LE: loop exit
PB: predicated region body
PF: predicated region fallthrough
CT: control target
= control target key end

     0   :  { %8 = vsyncpa [#allocation4], 0  ;;  %s194_s0 = inlined_call_operand.<no memory space> [shape: f32[1], index: 0, kind: input, shape index: {}]   ;;  %s195_s1 = inlined_call_operand.hbm [shape: f32[16,128], index: 1, kind: input, shape index: {}]   ;;  %s196_s2 = inlined_call_operand.hbm [shape: f32[16,128], index: 2, kind: output, shape index: {}]  }
   0x1   :  { %9 = vsyncpa [#allocation5], 0 }
   0x2   :  { %16 = vsyncadd [#allocation4], 256  ;;  %s142_s9 = smov [#allocation3]   ;;  %s94_s13 = scalar_lea.hbm %s195_s1, 256 }
   0x3   :  { %s17_s10 = sshll.u32 %s142_s9, 4  ;;  %p95_p0 = scmp.ne.s32.totalorder %s195_s1, %s94_s13  ;;  %s18_s10 = int_to_ptr.vmem [resolvable:$true] %s17_s10 }
   0x4   :  { %p98_p1 = scmp.lt.u32.totalorder %s94_s13, %s195_s1 }
   0x6   :  { %p100_p2 = pnand %p98_p1, %p95_p0 }
   0x8   :  { %103 = shalt.err (!%p100_p2)
}
   0x9   :  { %s104_s18 = scalar_lea.vmem %s18_s10, 256  ;;  %s108_s19 = scalar_lea.vmem %s18_s10, 512 }
   0xa   :  { %p105_p3 = scmp.ne.s32.totalorder %s18_s10, %s104_s18  ;;  %p109_p4 = scmp.lt.s32.totalorder %s18_s10, %s18_s10 }
   0xb   :  { %p110_p5 = scmp.lt.s32.totalorder %s108_s19, %s104_s18 }
   0xd   :  { %p111_p6 = por %p110_p5, %p109_p4 }
   0xf   :  { %p112_p7 = pnand %p111_p6, %p105_p3 }
  0x11   :  { %115 = shalt.err (!%p112_p7)
}
  0x12   :  { %s143_s20 = smov 128   ;;  %s144_s21 = smov 8  }
  0x13   :  { %23 = dma.hbm_to_vmem [thread:$0]  %s195_s1, 256, %s18_s10, [#allocation4], %s143_s20, %s143_s20, %s144_s21  }
  0x14   :  { %138 = dma.done.wait [#allocation4], 512  }
  0x15   :  { %139 = vsyncadd [#allocation4], 4294966784  ;;  %v29_v0 = vld [vmem:[#allocation3 + $0x10] sm:$0xff]  ;;  %v27_v1 = vld [vmem:[#allocation3] sm:$0xff]  ;;  %v52_v16 = vstv %s194_s0 }
  0x16   :  { %v30_v2 = vld [vmem:[#allocation3 + $0x18] sm:$0xff]  ;;  %v33_v3 = vmul.f32 %v29_v0, %v29_v0  ;;  %v31_v4 = vmul.f32 %v27_v1, %v27_v1  ;;  %v28_v5 = vld [vmem:[#allocation3 + $0x8] sm:$0xff] }
  0x17   :  { %v34_v6 = vmul.f32 %v30_v2, %v30_v2  ;;  %v32_v7 = vmul.f32 %v28_v5, %v28_v5 }
  0x18   :  { %39 = vadd.xlane.f32.xlu1 %v33_v3  ;;  %35 = vadd.xlane.f32.xlu0 %v31_v4 }
  0x1c   :  { %41 = vadd.xlane.f32.xlu1 %v34_v6  ;;  %37 = vadd.xlane.f32.xlu0 %v32_v7 }
  0xa5   :  { %v40_v8 = vpop.xlane.xlu1 %39  ;;  %v36_v9 = vpop.xlane.xlu0 %35 }
  0xa6   :  { %v46_v10 = vmax.f32 %v40_v8, 1e-10  ;;  %v44_v11 = vmax.f32 %v36_v9, 1e-10 }
  0xa8   :  { %86 = vrsqrt.f32 %v46_v10 }
  0xa9   :  { %88 = vrsqrt.f32 %v44_v11  ;;  %v42_v12 = vpop.xlane.xlu1 %41  ;;  %v38_v13 = vpop.xlane.xlu0 %37 }
  0xaa   :  { %v47_v14 = vmax.f32 %v42_v12, 1e-10  ;;  %v45_v15 = vmax.f32 %v38_v13, 1e-10 }
  0xac   :  { %90 = vrsqrt.f32 %v47_v14 }
  0xad   :  { %92 = vrsqrt.f32 %v45_v15 }
  0xb2   :  { %v87_v17 = vpop.eup %86 }
  0xb3   :  { %v89_v18 = vpop.eup %88  ;;  %v55_v19 = vmul.f32 %v87_v17, %v52_v16 }
  0xb4   :  { %v53_v20 = vmul.f32 %v89_v18, %v52_v16 }
  0xb5   :  { %v59_v21 = vmul.f32 %v55_v19, %v29_v0 }
  0xb6   :  { %v91_v22 = vpop.eup %90  ;;  %v57_v23 = vmul.f32 %v53_v20, %v27_v1 }
  0xb7   :  { %v93_v24 = vpop.eup %92  ;;  %63 = vst [vmem:[#allocation6 + $0x10] sm:$0xff] %v59_v21  ;;  %v56_v25 = vmul.f32 %v91_v22, %v52_v16 }
  0xb8   :  { %61 = vst [vmem:[#allocation6] sm:$0xff] %v57_v23  ;;  %v54_v26 = vmul.f32 %v93_v24, %v52_v16 }
  0xb9   :  { %v60_v27 = vmul.f32 %v56_v25, %v30_v2 }
  0xba   :  { %v58_v28 = vmul.f32 %v54_v26, %v28_v5 }
  0xbb   :  { %64 = vst [vmem:[#allocation6 + $0x18] sm:$0xff] %v60_v27 }
  0xbc   :  { %62 = vst [vmem:[#allocation6 + $0x8] sm:$0xff] %v58_v28 }
  0xbd   :  { %69 = vsyncadd [#allocation5], 256  ;;  %s145_s25 = smov [#allocation6]  }
  0xbe   :  { %s70_s26 = sshll.u32 %s145_s25, 4  ;;  %s71_s26 = int_to_ptr.vmem [resolvable:$true] %s70_s26 }
  0xbf   :  { %s116_s0 = scalar_lea.vmem %s71_s26, 256  ;;  %s120_s27 = scalar_lea.vmem %s71_s26, 512 }
  0xc0   :  { %p117_p8 = scmp.ne.s32.totalorder %s71_s26, %s116_s0  ;;  %p121_p9 = scmp.lt.s32.totalorder %s71_s26, %s71_s26 }
  0xc1   :  { %p122_p10 = scmp.lt.s32.totalorder %s120_s27, %s116_s0 }
  0xc3   :  { %p123_p11 = por %p122_p10, %p121_p9 }
  0xc5   :  { %p124_p12 = pnand %p123_p11, %p117_p8 }
  0xc7   :  { %127 = shalt.err (!%p124_p12)
}
  0xc8   :  { %s128_s30 = scalar_lea.hbm %s196_s2, 256 }
  0xc9   :  { %p129_p13 = scmp.ne.s32.totalorder %s196_s2, %s128_s30  ;;  %p132_p0 = scmp.lt.u32.totalorder %s128_s30, %s196_s2 }
  0xcb   :  { %p134_p1 = pnand %p132_p0, %p129_p13 }
  0xcd   :  { %137 = shalt.err (!%p134_p1)
}
  0xce   :  { %76 = dma.vmem_to_hbm [thread:$0]  %s71_s26, 256, %s196_s2, [#allocation5], %s143_s20, %s143_s20, %s144_s21  }
  0xcf   :  { %140 = dma.done.wait [#allocation5], 512  }
  0xd0   :  { %141 = vsyncadd [#allocation5], 4294966784 }
  0xd1   :  { %80 = vsyncpa [#allocation4], 1 }
  0xd2   :  { %81 = vsyncpa [#allocation5], 1 }

</bundles_post_ra>
